<compile_context>
chip_gen: v6e
topology: v6e:2x2x1
jax: 0.10.0
libtpu: 0.0.40
codegen_flags: <defaults>
</compile_context>

<pallas_src>
import jax
import jax.numpy as jnp
from jax.experimental import pallas as pl
from jax.experimental.pallas import tpu as pltpu


# ---------------------------------------------------------------------------
# Kernels
# ---------------------------------------------------------------------------
def _fused_copy_kernel(*refs):
    """Identity copy: out_ref[i] <- in_ref[i] for all scales in one launch."""
    n = len(refs) // 2
    for i in range(n):
        refs[n + i][...] = refs[i][...]


def _tiled_copy_kernel(x_ref, o_ref):
    """Identity copy of one (block_rows, lanes) tile (used for large maps)."""
    o_ref[...] = x_ref[...]


# ---------------------------------------------------------------------------
# Wrappers
# ---------------------------------------------------------------------------
_LANE = 128
_FUSED_VMEM_BUDGET_BYTES = 24 * 1024 * 1024  # stay well under v7x 32 MiB scoped


def _lane_dense_2d(x: jax.Array) -> jax.Array:
    """Contiguous (metadata-only, bit-exact) flatten to a lane-dense slab."""
    total = x.size
    if total % _LANE == 0:
        return x.reshape(total // _LANE, _LANE)
    # Fallback for odd sizes: fold all leading dims, keep last dim on lanes.
    return x.reshape(-1, x.shape[-1])


def _fused_identity(slabs):
    """One pallas_call copying every slab (whole arrays resident in VMEM)."""
    n = len(slabs)
    outs = pl.pallas_call(
        _fused_copy_kernel,
        out_shape=tuple(jax.ShapeDtypeStruct(s.shape, s.dtype) for s in slabs),
        in_specs=tuple(
            pl.BlockSpec(memory_space=pltpu.MemorySpace.VMEM) for _ in range(n)
        ),
        out_specs=tuple(
            pl.BlockSpec(memory_space=pltpu.MemorySpace.VMEM) for _ in range(n)
        ),
    )(*slabs)
    return list(outs)


def _tiled_identity(x2d: jax.Array, block_rows: int = 512) -> jax.Array:
    """Row-tiled copy for slabs too big to stage whole in VMEM."""
    rows, lanes = x2d.shape
    br = min(block_rows, rows)  # br == rows (full extent) or a multiple of 8
    grid = (pl.cdiv(rows, br),)
    return pl.pallas_call(
        _tiled_copy_kernel,
        out_shape=jax.ShapeDtypeStruct(x2d.shape, x2d.dtype),
        grid=grid,
        in_specs=[pl.BlockSpec((br, lanes), lambda i: (i, 0))],
        out_specs=pl.BlockSpec((br, lanes), lambda i: (i, 0)),
        compiler_params=pltpu.CompilerParams(
            dimension_semantics=("parallel",),
            vmem_limit_bytes=64 * 1024 * 1024,
        ),
    )(x2d)


class YOLOV3NeckLitePallas:
    """JAX/Pallas equivalent of mmdet YOLOV3Neck_lite (the 'lite' forward).

    The lite variant instantiates no sub-modules, so there are no weights.
    """

    def __init__(self, num_scales, in_channels, out_channels):
        assert num_scales == len(in_channels) == len(out_channels)
        self.num_scales = num_scales
        self.in_channels = in_channels
        self.out_channels = out_channels
        # TODO(synk): the full (non-lite) YOLOV3Neck forward (DetectionBlock /
        # ConvModule / interpolate / cat) is commented out in the reference
        # source, so it is intentionally not implemented here.

    def __call__(self, feats):
        assert len(feats) == self.num_scales
        # Semantics: outs[i] = feats[num_scales - 1 - i].  Do the reversal in
        # Python (free) and route the data through one fused Pallas copy.
        rev = [feats[len(feats) - 1 - i] for i in range(len(feats))]
        slabs = [_lane_dense_2d(x) for x in rev]

        total_bytes = 2 * sum(s.size * s.dtype.itemsize for s in slabs)
        if total_bytes <= _FUSED_VMEM_BUDGET_BYTES:
            outs2d = _fused_identity(slabs)
        else:
            # Large realistic feature maps: per-scale tiled copy (512x128
            # f32 blocks, grid axis parallel across TensorCores).
            outs2d = [_tiled_identity(s) for s in slabs]

        return [o.reshape(x.shape) for o, x in zip(outs2d, rev)]


# ---------------------------------------------------------------------------
# Self-test
# ---------------------------------------------------------------------------
if __name__ == "__main__":
    key = jax.random.PRNGKey(0)

    # Small synthetic feature pyramid, top (high-level, small spatial) to
    # bottom (low-level, large spatial), as the module docstring specifies.
    num_scales = 3
    in_channels = [16, 8, 4]
    out_channels = [16, 8, 4]
    batch = 2
    spatials = [4, 8, 16]  # high-lvl -> low-lvl

    keys = jax.random.split(key, num_scales)
    feats = tuple(
        jax.random.normal(
            keys[i],
            (batch, in_channels[i], spatials[i], spatials[i]),
            dtype=jnp.float32,
        )
        for i in range(num_scales)
    )

    neck = YOLOV3NeckLitePallas(num_scales, in_channels, out_channels)
    outs = neck(feats)
    outs = [jax.block_until_ready(o) for o in outs]

    # Verify semantics: outs is feats reversed, values unchanged (bit-exact).
    ok = True
    for i in range(num_scales):
        ref = feats[num_scales - 1 - i]
        ok &= outs[i].shape == ref.shape
        ok &= bool(jnp.array_equal(outs[i], ref))
    assert ok, "Pallas YOLOV3Neck_lite output mismatch"

    print("KERNEL_OK")
</pallas_src>

<mosaic_0001>
module attributes {stable_mosaic.version = 11 : i64} {
  func.func @_fused_copy_kernel(%arg0: memref<16x128xf32, #tpu.memory_space<vmem>>, %arg1: memref<8x128xf32, #tpu.memory_space<vmem>>, %arg2: memref<4x128xf32, #tpu.memory_space<vmem>>, %arg3: memref<16x128xf32, #tpu.memory_space<vmem>>, %arg4: memref<8x128xf32, #tpu.memory_space<vmem>>, %arg5: memref<4x128xf32, #tpu.memory_space<vmem>>) attributes {dimension_semantics = [], scalar_prefetch = 0 : i64, scratch_operands = 0 : i64, tpu.core_type = #tpu.core_type<tc>} {
    %c0 = arith.constant 0 : index
    %c0_0 = arith.constant 0 : index
    %0 = vector.load %arg0[%c0, %c0_0] : memref<16x128xf32, #tpu.memory_space<vmem>>, vector<16x128xf32>
    %c0_1 = arith.constant 0 : index
    %c0_2 = arith.constant 0 : index
    %1 = vector.load %arg3[%c0_1, %c0_2] : memref<16x128xf32, #tpu.memory_space<vmem>>, vector<16x128xf32>
    tpu.vector_store %arg3[%c0_1, %c0_2], %0 {strides = array<i32>} : memref<16x128xf32, #tpu.memory_space<vmem>>, vector<16x128xf32>,
    %c0_3 = arith.constant 0 : index
    %c0_4 = arith.constant 0 : index
    %2 = vector.load %arg1[%c0_3, %c0_4] : memref<8x128xf32, #tpu.memory_space<vmem>>, vector<8x128xf32>
    %c0_5 = arith.constant 0 : index
    %c0_6 = arith.constant 0 : index
    %3 = vector.load %arg4[%c0_5, %c0_6] : memref<8x128xf32, #tpu.memory_space<vmem>>, vector<8x128xf32>
    tpu.vector_store %arg4[%c0_5, %c0_6], %2 {strides = array<i32>} : memref<8x128xf32, #tpu.memory_space<vmem>>, vector<8x128xf32>,
    %c0_7 = arith.constant 0 : index
    %c0_8 = arith.constant 0 : index
    %4 = vector.load %arg2[%c0_7, %c0_8] : memref<4x128xf32, #tpu.memory_space<vmem>>, vector<4x128xf32>
    %c0_9 = arith.constant 0 : index
    %c0_10 = arith.constant 0 : index
    %5 = vector.load %arg5[%c0_9, %c0_10] : memref<4x128xf32, #tpu.memory_space<vmem>>, vector<4x128xf32>
    tpu.vector_store %arg5[%c0_9, %c0_10], %4 {strides = array<i32>} : memref<4x128xf32, #tpu.memory_space<vmem>>, vector<4x128xf32>,
    return
  }
}

</mosaic_0001>

<bundles_post_ra>
// kernel: tpu_custom_call.1
= control target key start
LH: loop header
LB: loop body
LE: loop exit
PB: predicated region body
PF: predicated region fallthrough
CT: control target
= control target key end

     0   :  { %11 = vsyncpa [#allocation3], 0  ;;  %s307_s0 = inlined_call_operand.hbm [shape: f32[16,128], index: 0, kind: input, shape index: {}]   ;;  %s308_s1 = inlined_call_operand.hbm [shape: f32[8,128], index: 1, kind: input, shape index: {}]   ;;  %s309_s2 = inlined_call_operand.hbm [shape: f32[4,128], index: 2, kind: input, shape index: {}]   ;;  %s310_s3 = inlined_call_operand.hbm [shape: f32[16,128], index: 3, kind: output, shape index: {0}]   ;;  %s311_s4 = inlined_call_operand.hbm [shape: f32[8,128], index: 4, kind: output, shape index: {1}]   ;;  %s312_s5 = inlined_call_operand.hbm [shape: f32[4,128], index: 5, kind: output, shape index: {2}]  }
   0x1   :  { %12 = vsyncpa [#allocation6], 0 }
   0x2   :  { %13 = vsyncpa [#allocation4], 0 }
   0x3   :  { %14 = vsyncpa [#allocation10], 0  ;;  %s245_s18 = smov [#allocation5]   ;;  %s246_s20 = smov [#allocation2]  }
   0x4   :  { %s33_s19 = sshll.u32 %s245_s18, 4  ;;  %s20_s21 = sshll.u32 %s246_s20, 4  ;;  %s34_s19 = int_to_ptr.vmem [resolvable:$true] %s33_s19  ;;  %s21_s21 = int_to_ptr.vmem [resolvable:$true] %s20_s21 }
   0x5   :  { %s125_s22 = scalar_lea.vmem %s34_s19, 128  ;;  %p130_p1 = scmp.lt.s32.totalorder %s34_s19, %s34_s19 }
   0x6   :  { %p126_p0 = scmp.ne.s32.totalorder %s34_s19, %s125_s22  ;;  %p131_p2 = scmp.lt.s32.totalorder %s125_s22, %s125_s22 }
   0x8   :  { %p132_p3 = por %p131_p2, %p130_p1 }
   0xa   :  { %p133_p4 = pnand %p132_p3, %p126_p0 }
   0xc   :  { %136 = shalt.err (!%p133_p4)
}
   0xd   :  { %36 = dma.hbm_to_vmem [thread:$0]  %s308_s1, 128, %s34_s19, [#allocation6]  }
   0xe   :  { %s145_s25 = scalar_lea.vmem %s21_s21, 256  ;;  %p150_p6 = scmp.lt.s32.totalorder %s21_s21, %s21_s21 }
   0xf   :  { %p146_p5 = scmp.ne.s32.totalorder %s21_s21, %s145_s25  ;;  %p151_p7 = scmp.lt.s32.totalorder %s145_s25, %s145_s25 }
  0x11   :  { %p152_p8 = por %p151_p7, %p150_p6 }
  0x13   :  { %p153_p9 = pnand %p152_p8, %p146_p5 }
  0x15   :  { %156 = shalt.err (!%p153_p9)
}
  0x16   :  { %s247_s26 = smov 128   ;;  %s248_s27 = smov 8  }
  0x17   :  { %26 = dma.hbm_to_vmem [thread:$0]  %s307_s0, 256, %s21_s21, [#allocation3], %s247_s26, %s247_s26, %s248_s27  }
  0x18   :  { %s249_s30 = smov [#allocation7]  }
  0x19   :  { %s43_s6 = sshll.u32 %s249_s30, 4  ;;  %s44_s6 = int_to_ptr.vmem [resolvable:$true] %s43_s6 }
  0x1a   :  { %s165_s1 = scalar_lea.vmem %s44_s6, 64  ;;  %p170_p11 = scmp.lt.s32.totalorder %s44_s6, %s44_s6 }
  0x1b   :  { %p166_p10 = scmp.ne.s32.totalorder %s44_s6, %s165_s1  ;;  %p171_p12 = scmp.lt.s32.totalorder %s165_s1, %s165_s1 }
  0x1d   :  { %p172_p13 = por %p171_p12, %p170_p11 }
  0x1f   :  { %p173_p0 = pnand %p172_p13, %p166_p10 }
  0x21   :  { %176 = shalt.err (!%p173_p0)
}
  0x22   :  { %46 = dma.hbm_to_vmem [thread:$0]  %s309_s2, 64, %s44_s6, [#allocation6]  }
  0x23   :  { %237 = dma.done.wait [#allocation3], 256  }
  0x24   :  { %238 = vsyncadd [#allocation3], 4294967040 }
  0x25   :  { %239 = dma.done.wait [#allocation6], 192  }
  0x26   :  { %240 = vsyncadd [#allocation6], 4294967104  ;;  %s250_s9 = smov [#allocation9]   ;;  %s251_s10 = smov [#allocation8]   ;;  %v60_v0 = vld [vmem:[#allocation5] sm:$0xff]  ;;  %v56_v1 = vld [vmem:[#allocation2] sm:$0xff] }
  0x27   :  { %s82_s0 = sshll.u32 %s250_s9, 4  ;;  %s69_s11 = sshll.u32 %s251_s10, 4  ;;  %v57_v2 = vld [vmem:[#allocation2 + $0x8] sm:$0xff]  ;;  %61 = vst [vmem:[#allocation9] sm:$0xff] %v60_v0  ;;  %58 = vst [vmem:[#allocation8] sm:$0xff] %v56_v1  ;;  %s83_s0 = int_to_ptr.vmem [resolvable:$true] %s82_s0  ;;  %s70_s11 = int_to_ptr.vmem [resolvable:$true] %s69_s11 }
  0x28   :  { %s252_s12 = smov [#allocation11]   ;;  %59 = vst [vmem:[#allocation8 + $0x8] sm:$0xff] %v57_v2  ;;  %v62_v3 = vld [vmem:[#allocation7] sm:$0xf]  ;;  %s177_s2 = scalar_lea.vmem %s83_s0, 128 }
  0x29   :  { %s92_s13 = sshll.u32 %s252_s12, 4  ;;  %63 = vst [vmem:[#allocation11] sm:$0xf] %v62_v3  ;;  %p178_p1 = scmp.ne.s32.totalorder %s83_s0, %s177_s2  ;;  %s93_s13 = int_to_ptr.vmem [resolvable:$true] %s92_s13 }
  0x2a   :  { %p182_p2 = scmp.lt.s32.totalorder %s83_s0, %s83_s0  ;;  %p183_p3 = scmp.lt.s32.totalorder %s177_s2, %s177_s2 }
  0x2c   :  { %p184_p4 = por %p183_p3, %p182_p2 }
  0x2e   :  { %p185_p5 = pnand %p184_p4, %p178_p1 }
  0x30   :  { %188 = shalt.err (!%p185_p5)
}
  0x31   :  { %85 = dma.vmem_to_hbm [thread:$0]  %s83_s0, 128, %s311_s4, [#allocation10]  }
  0x32   :  { %s197_s16 = scalar_lea.vmem %s70_s11, 256  ;;  %p202_p7 = scmp.lt.s32.totalorder %s70_s11, %s70_s11 }
  0x33   :  { %p198_p6 = scmp.ne.s32.totalorder %s70_s11, %s197_s16  ;;  %p203_p8 = scmp.lt.s32.totalorder %s197_s16, %s197_s16 }
  0x35   :  { %p204_p9 = por %p203_p8, %p202_p7 }
  0x37   :  { %p205_p10 = pnand %p204_p9, %p198_p6 }
  0x39   :  { %208 = shalt.err (!%p205_p10)
}
  0x3a   :  { %75 = dma.vmem_to_hbm [thread:$0]  %s70_s11, 256, %s310_s3, [#allocation4], %s247_s26, %s247_s26, %s248_s27  }
  0x3b   :  { %s217_s19 = scalar_lea.vmem %s93_s13, 64  ;;  %p222_p12 = scmp.lt.s32.totalorder %s93_s13, %s93_s13 }
  0x3c   :  { %p218_p11 = scmp.ne.s32.totalorder %s93_s13, %s217_s19  ;;  %p223_p13 = scmp.lt.s32.totalorder %s217_s19, %s217_s19 }
  0x3e   :  { %p224_p0 = por %p223_p13, %p222_p12 }
  0x40   :  { %p225_p1 = pnand %p224_p0, %p218_p11 }
  0x42   :  { %228 = shalt.err (!%p225_p1)
}
  0x43   :  { %95 = dma.vmem_to_hbm [thread:$0]  %s93_s13, 64, %s312_s5, [#allocation10]  }
  0x44   :  { %241 = dma.done.wait [#allocation4], 256  }
  0x45   :  { %242 = vsyncadd [#allocation4], 4294967040 }
  0x46   :  { %243 = dma.done.wait [#allocation10], 192  }
  0x47   :  { %244 = vsyncadd [#allocation10], 4294967104 }
  0x48   :  { %105 = vsyncpa [#allocation3], 1 }
  0x49   :  { %106 = vsyncpa [#allocation6], 1 }
  0x4a   :  { %107 = vsyncpa [#allocation4], 1 }
  0x4b   :  { %108 = vsyncpa [#allocation10], 1 }

</bundles_post_ra>
